<compile_context>
chip_gen: v7x
topology: tpu7x:2x2x1
jax: 0.10.0
libtpu: 0.0.40
codegen_flags: <defaults>
</compile_context>

<pallas_src>
import math
import jax
import jax.numpy as jnp
from jax.experimental import pallas as pl
from jax.experimental.pallas import tpu as pltpu


def _ceil_to(v, m):
    return ((v + m - 1) // m) * m


def basic_block_kernel(x_ref, w1t_ref, b1_ref, w2t_ref, b2_ref, o_ref):
    # x tile: (tb, P) f32.  Weights arrive pre-transposed as (in, out).
    x_f32 = x_ref[...].astype(jnp.float32)

    # Linear1: x @ W1^T + b1  (MXU, f32 accumulation)
    h = jnp.dot(x_ref[...].astype(w1t_ref.dtype), w1t_ref[...],
                preferred_element_type=jnp.float32)
    h = jnp.maximum(h + b1_ref[...], 0.0)                     # bias + ReLU in f32

    # Linear2: h @ W2^T + b2
    y = jnp.dot(h.astype(w2t_ref.dtype), w2t_ref[...],
                preferred_element_type=jnp.float32)
    y = y + b2_ref[...] + x_f32                               # residual in f32

    o_ref[...] = jnp.maximum(y, 0.0).astype(o_ref.dtype)


def basic_block(x, w1, b1, w2, b2, *, tb=None, matmul_dtype=None):
    """Residual MLP block.

    x : (B, P) float32
    w1, w2 : (P, P) PyTorch layout (out_features, in_features)
    b1, b2 : (P,) or (1, P)
    tb : rows per grid step (rounded up to a multiple of 8)
    matmul_dtype : e.g. jnp.bfloat16 to run the MXU dots in bf16
                   (f32 accumulation; elementwise math stays f32).
    """
    B, P = x.shape
    f32 = jnp.float32

    # --- pad planes to a lane-dense multiple of 128, batch to a multiple of tb
    Pp = _ceil_to(max(P, 128), 128)
    if tb is None:
        # Large-ish tiles (up to 512 rows); stays sublane-aligned.
        tb = min(512, _ceil_to(B, 8))
    tb = max(8, _ceil_to(tb, 8))
    Bp = _ceil_to(B, tb)

    x_p = jnp.zeros((Bp, Pp), f32).at[:B, :P].set(x.astype(f32))

    def _prep_w(w):
        wp = jnp.zeros((Pp, Pp), f32).at[:P, :P].set(w.astype(f32))
        wt = wp.T  # pre-transpose ONCE, outside the grid loop -> (in, out)
        if matmul_dtype is not None:
            wt = wt.astype(matmul_dtype)
        return wt

    def _prep_b(b):
        b = jnp.reshape(b.astype(f32), (1, -1))
        return jnp.zeros((1, Pp), f32).at[:, :P].set(b)

    w1t, w2t = _prep_w(w1), _prep_w(w2)
    b1p, b2p = _prep_b(b1), _prep_b(b2)

    grid = (Bp // tb,)

    out_p = pl.pallas_call(
        basic_block_kernel,
        out_shape=jax.ShapeDtypeStruct((Bp, Pp), x.dtype),
        grid_spec=pltpu.PrefetchScalarGridSpec(
            num_scalar_prefetch=0,
            grid=grid,
            in_specs=[
                pl.BlockSpec((tb, Pp), lambda i: (i, 0)),    # x tile (streamed)
                pl.BlockSpec((Pp, Pp), lambda i: (0, 0)),    # W1^T (resident)
                pl.BlockSpec((1, Pp), lambda i: (0, 0)),     # b1   (resident)
                pl.BlockSpec((Pp, Pp), lambda i: (0, 0)),    # W2^T (resident)
                pl.BlockSpec((1, Pp), lambda i: (0, 0)),     # b2   (resident)
            ],
            out_specs=pl.BlockSpec((tb, Pp), lambda i: (i, 0)),
        ),
        compiler_params=pltpu.CompilerParams(
            dimension_semantics=("parallel",)),
    )(x_p, w1t, b1p, w2t, b2p)

    return out_p[:B, :P]


def init_linear_params(key, in_f, out_f):
    """PyTorch-default-style init: U(-1/sqrt(in), 1/sqrt(in))."""
    kw, kb = jax.random.split(key)
    bound = 1.0 / math.sqrt(in_f)
    w = jax.random.uniform(kw, (out_f, in_f), jnp.float32, -bound, bound)
    b = jax.random.uniform(kb, (out_f,), jnp.float32, -bound, bound)
    return w, b


if __name__ == "__main__":
    planes = 32
    batch = 16   # with tb=8 -> grid=(2,): exercises pipelining / megacore path

    key = jax.random.PRNGKey(0)
    kx, k1, k2 = jax.random.split(key, 3)

    x = jax.random.normal(kx, (batch, planes), jnp.float32)
    w1, b1 = init_linear_params(k1, planes, planes)
    w2, b2 = init_linear_params(k2, planes, planes)

    # Pure-JAX reference.
    ref = jnp.maximum(
        jnp.maximum(x @ w1.T + b1[None, :], 0.0) @ w2.T + b2[None, :] + x, 0.0)

    # f32 MXU path — exact semantics.
    out = basic_block(x, w1, b1, w2, b2, tb=8)
    out = jax.block_until_ready(out)
    assert out.shape == (batch, planes)
    assert jnp.allclose(out, ref, atol=1e-5, rtol=1e-5)

    # bf16 MXU path (f32 accumulation) — looser tolerance for bf16 mantissa.
    out_bf16 = basic_block(x, w1, b1, w2, b2, tb=8, matmul_dtype=jnp.bfloat16)
    out_bf16 = jax.block_until_ready(out_bf16)
    assert jnp.allclose(out_bf16, ref, atol=5e-2, rtol=5e-2)

    print("KERNEL_OK")
</pallas_src>

<mosaic_0001>
module attributes {stable_mosaic.version = 11 : i64} {
  func.func @basic_block_kernel(%arg0: i32, %arg1: memref<8x128xf32, #tpu.memory_space<vmem>>, %arg2: memref<128x128xf32, #tpu.memory_space<vmem>>, %arg3: memref<1x128xf32, #tpu.memory_space<vmem>>, %arg4: memref<128x128xf32, #tpu.memory_space<vmem>>, %arg5: memref<1x128xf32, #tpu.memory_space<vmem>>, %arg6: memref<8x128xf32, #tpu.memory_space<vmem>>) attributes {dimension_semantics = [#tpu.dimension_semantics<parallel>], iteration_bounds = array<i64: 2>, scalar_prefetch = 0 : i64, scratch_operands = 0 : i64, tpu.core_type = #tpu.core_type<tc>, window_params = [{transform_indices = @transform_0, window_bounds = array<i64: 8, 128>}, {pipeline_mode = #tpu.pipeline_mode<synchronous>, transform_indices = @transform_1, window_bounds = array<i64: 128, 128>}, {pipeline_mode = #tpu.pipeline_mode<synchronous>, transform_indices = @transform_2, window_bounds = array<i64: 1, 128>}, {pipeline_mode = #tpu.pipeline_mode<synchronous>, transform_indices = @transform_3, window_bounds = array<i64: 128, 128>}, {pipeline_mode = #tpu.pipeline_mode<synchronous>, transform_indices = @transform_4, window_bounds = array<i64: 1, 128>}, {transform_indices = @transform_5, window_bounds = array<i64: 8, 128>}]} {
    %c0 = arith.constant 0 : index
    %c0_0 = arith.constant 0 : index
    %0 = vector.load %arg1[%c0, %c0_0] : memref<8x128xf32, #tpu.memory_space<vmem>>, vector<8x128xf32>
    %c0_1 = arith.constant 0 : index
    %c0_2 = arith.constant 0 : index
    %1 = vector.load %arg1[%c0_1, %c0_2] : memref<8x128xf32, #tpu.memory_space<vmem>>, vector<8x128xf32>
    %c0_3 = arith.constant 0 : index
    %c0_4 = arith.constant 0 : index
    %2 = vector.load %arg2[%c0_3, %c0_4] : memref<128x128xf32, #tpu.memory_space<vmem>>, vector<128x128xf32>
    %cst = arith.constant dense<0.000000e+00> : vector<8x128xf32>
    %3 = tpu.matmul %1, %2, %cst {dimension_numbers = #tpu.dot_dimension_numbers<[1], [0], [0], [1], [0, 0, 1, 1], [], []>} : vector<8x128xf32>, vector<128x128xf32>, vector<8x128xf32> -> vector<8x128xf32>
    %c0_5 = arith.constant 0 : index
    %c0_6 = arith.constant 0 : index
    %4 = vector.load %arg3[%c0_5, %c0_6] : memref<1x128xf32, #tpu.memory_space<vmem>>, vector<1x128xf32>
    %5 = vector.broadcast %4 : vector<1x128xf32> to vector<8x128xf32>
    %6 = arith.addf %3, %5 : vector<8x128xf32>
    %cst_7 = arith.constant 0.000000e+00 : f32
    %7 = vector.broadcast %cst_7 : f32 to vector<8x128xf32>
    %8 = arith.maximumf %6, %7 : vector<8x128xf32>
    %c0_8 = arith.constant 0 : index
    %c0_9 = arith.constant 0 : index
    %9 = vector.load %arg4[%c0_8, %c0_9] : memref<128x128xf32, #tpu.memory_space<vmem>>, vector<128x128xf32>
    %cst_10 = arith.constant dense<0.000000e+00> : vector<8x128xf32>
    %10 = tpu.matmul %8, %9, %cst_10 {dimension_numbers = #tpu.dot_dimension_numbers<[1], [0], [0], [1], [0, 0, 1, 1], [], []>} : vector<8x128xf32>, vector<128x128xf32>, vector<8x128xf32> -> vector<8x128xf32>
    %c0_11 = arith.constant 0 : index
    %c0_12 = arith.constant 0 : index
    %11 = vector.load %arg5[%c0_11, %c0_12] : memref<1x128xf32, #tpu.memory_space<vmem>>, vector<1x128xf32>
    %12 = vector.broadcast %11 : vector<1x128xf32> to vector<8x128xf32>
    %13 = arith.addf %10, %12 : vector<8x128xf32>
    %14 = arith.addf %13, %0 : vector<8x128xf32>
    %cst_13 = arith.constant 0.000000e+00 : f32
    %15 = vector.broadcast %cst_13 : f32 to vector<8x128xf32>
    %16 = arith.maximumf %14, %15 : vector<8x128xf32>
    %c0_14 = arith.constant 0 : index
    %c0_15 = arith.constant 0 : index
    %17 = vector.load %arg6[%c0_14, %c0_15] : memref<8x128xf32, #tpu.memory_space<vmem>>, vector<8x128xf32>
    tpu.vector_store %arg6[%c0_14, %c0_15], %16 {strides = array<i32>} : memref<8x128xf32, #tpu.memory_space<vmem>>, vector<8x128xf32>,
    return
  }
  func.func @transform_0(%arg0: i32) -> (i32, i32) {
    %c0_i32 = arith.constant 0 : i32
    %c0_i32_0 = arith.constant 0 : i32
    return %arg0, %c0_i32 : i32, i32
  }
  func.func @transform_1(%arg0: i32) -> (i32, i32) {
    %c0_i32 = arith.constant 0 : i32
    %c0_i32_0 = arith.constant 0 : i32
    %c0_i32_1 = arith.constant 0 : i32
    return %c0_i32, %c0_i32_0 : i32, i32
  }
  func.func @transform_2(%arg0: i32) -> (i32, i32) {
    %c0_i32 = arith.constant 0 : i32
    %c0_i32_0 = arith.constant 0 : i32
    %c0_i32_1 = arith.constant 0 : i32
    return %c0_i32, %c0_i32_0 : i32, i32
  }
  func.func @transform_3(%arg0: i32) -> (i32, i32) {
    %c0_i32 = arith.constant 0 : i32
    %c0_i32_0 = arith.constant 0 : i32
    %c0_i32_1 = arith.constant 0 : i32
    return %c0_i32, %c0_i32_0 : i32, i32
  }
  func.func @transform_4(%arg0: i32) -> (i32, i32) {
    %c0_i32 = arith.constant 0 : i32
    %c0_i32_0 = arith.constant 0 : i32
    %c0_i32_1 = arith.constant 0 : i32
    return %c0_i32, %c0_i32_0 : i32, i32
  }
  func.func @transform_5(%arg0: i32) -> (i32, i32) {
    %c0_i32 = arith.constant 0 : i32
    %c0_i32_0 = arith.constant 0 : i32
    return %arg0, %c0_i32 : i32, i32
  }
}

</mosaic_0001>

<bundles_post_ra>
// kernel: tpu_custom_call.1
= control target key start
LH: loop header
LB: loop body
LE: loop exit
PB: predicated region body
PF: predicated region fallthrough
CT: control target
= control target key end

     0   :  { %10 = vsyncpa [#allocation3], 0  ;;  %s1260_s0 = inlined_call_operand.hbm [shape: f32[16,128], index: 0, kind: input, shape index: {}]   ;;  %s1261_s1 = inlined_call_operand.hbm [shape: f32[128,128], index: 1, kind: input, shape index: {}]   ;;  %s1262_s2 = inlined_call_operand.vmem [shape: f32[1,128], index: 2, kind: input, shape index: {}]   ;;  %s1263_s3 = inlined_call_operand.hbm [shape: f32[128,128], index: 3, kind: input, shape index: {}]   ;;  %s1264_s4 = inlined_call_operand.vmem [shape: f32[1,128], index: 4, kind: input, shape index: {}]   ;;  %s1265_s5 = inlined_call_operand.hbm [shape: f32[16,128], index: 5, kind: output, shape index: {}]  }
   0x1   :  { %12 = vsyncpa [#allocation3 + $0x1], 0 }
   0x2   :  { %13 = vsyncpa [#allocation6], 0 }
   0x3   :  { %14 = vsyncpa [#allocation4], 0 }
   0x4   :  { %16 = vsyncpa [#allocation4 + $0x1], 0  ;;  %s1002_s18 = smov 0   ;;  %s1004_s19 = smov 0  }
   0x5   :  { %s1006_s20 = smov 0   ;;  %s1008_s21 = smov 0  }
   0x6 LB: > { %s1023_s22 = sadd.s32 4294967295, %s961_s21   ;;  %s563_s23 = sadd.s32 4294967294, %s961_s21   ;;  %s961_s21 = sphi %s1008_s21, %s1285_s21   ;;  %s957_s20 = sphi %s1006_s20, %s1284_s20   ;;  %s953_s19 = sphi %s1004_s19, %s1283_s19   ;;  %s949_s18 = sphi %s1002_s18, %s1282_s18  }
   0x7   : > { %p42_p0 = scmp.ne.s32.totalorder %s953_s19, %s949_s18  ;;  %p1266_p1 = scmp.eq.s32.totalorder %s1023_s22, 0 }
   0x8   : > { %p156_p3 = scmp.eq.s32.totalorder %s563_s23, 1  ;;  %p564_p5 = scmp.ge.s32.totalorder %s961_s21, 1 }
   0x9   : > { %p1032_p4 = por %p1266_p1, %p42_p0  ;;  %p163_p7 = scmp.lt.s32.totalorder %s961_s21, 3 }
   0xa   : > { %p1037_p6 = por %p156_p3, %p42_p0  ;;  %s963_s27 = smov [#allocation5]  }
   0xb   : > { %s1269_s24 = scalar_select %p1032_p4, 1, 0 }
   0xc   : > { %s1270_s25 = scalar_select %p1037_p6, 1, 0 }
   0xd   : > { %p1042_p8 = pnand %p564_p5, %p163_p7  ;;  %s175_s28 = sshll.u32 %s963_s27, 4  ;;  %s1046_s28 = int_to_ptr.vmem [resolvable:$true] %s175_s28 }
   0xe   : > { %s964_s30 = smov [#allocation7]   ;;  %s805_s9 = scalar_lea.hbm %s1261_s1, 2048 }
   0xf   : > { %p745_p9 = pneg %p1042_p8  ;;  %s191_s6 = sshll.u32 %s964_s30, 4  ;;  %s1057_s6 = int_to_ptr.vmem [resolvable:$true] %s191_s6 }
  0x10   : > { %p806_p12 = scmp.ne.s32.totalorder %s1261_s1, %s805_s9  ;;  %p812_p5 = scmp.lt.u32.totalorder %s805_s9, %s1261_s1 }
  0x11   : > { %p1053_p11 = pnand %p745_p9, %p1266_p1 }
  0x13   : > { %p807_p13 = pneg %p1053_p11 }
  0x15   : > { %p808_p0 = pnand %p807_p13, %p806_p12 }
  0x17   : > { %p809_p3 = pneg %p808_p0 }
  0x19   : > { %p814_p7 = pnand %p812_p5, %p809_p3 }
  0x1b   : > { %817 = shalt.err (!%p814_p7)
}
  0x1c   : > { %s818_s14 = scalar_lea.vmem %s1046_s28, 2048  ;;  %p826_p2 = scmp.lt.s32.totalorder %s1046_s28, %s1046_s28 }
  0x1d   : > { %p819_p9 = scmp.ne.s32.totalorder %s1046_s28, %s818_s14  ;;  %p827_p12 = scmp.lt.s32.totalorder %s818_s14, %s818_s14 }
  0x1f   : > { %p821_p10 = pnand %p819_p9, %p807_p13  ;;  %p828_p0 = por %p827_p12, %p826_p2 }
  0x21   : > { %p822_p1 = pneg %p821_p10 }
  0x23   : > { %p829_p6 = pnand %p828_p0, %p822_p1 }
  0x25   : > { %832 = shalt.err (!%p829_p6)
}
  0x26   : > { %s965_s15 = smov 128   ;;  %s966_s16 = smov 8  }
  0x27   : > { %748 = dma.hbm_to_vmem [thread:$0]  (!%p1053_p11), %s1261_s1, 2048, %s1046_s28, [#allocation6], %s965_s15, %s965_s15, %s966_s16  }
  0x28   : > { %s833_s7 = scalar_lea.hbm %s1263_s3, 2048 }
  0x29   : > { %p834_p2 = scmp.ne.s32.totalorder %s1263_s3, %s833_s7  ;;  %p840_p10 = scmp.lt.u32.totalorder %s833_s7, %s1263_s3 }
  0x2b   : > { %p836_p1 = pnand %p834_p2, %p807_p13 }
  0x2d   : > { %p837_p6 = pneg %p836_p1 }
  0x2f   : > { %p842_p3 = pnand %p840_p10, %p837_p6 }
  0x31   : > { %845 = shalt.err (!%p842_p3)
}
  0x32   : > { %s846_s28 = scalar_lea.vmem %s1057_s6, 2048  ;;  %p854_p12 = scmp.lt.s32.totalorder %s1057_s6, %s1057_s6 }
  0x33   : > { %p847_p5 = scmp.ne.s32.totalorder %s1057_s6, %s846_s28  ;;  %p855_p0 = scmp.lt.s32.totalorder %s846_s28, %s846_s28 }
  0x35   : > { %p849_p7 = pnand %p847_p5, %p807_p13  ;;  %p856_p2 = por %p855_p0, %p854_p12 }
  0x37   : > { %p850_p9 = pneg %p849_p7 }
  0x39   : > { %p857_p1 = pnand %p856_p2, %p850_p9 }
  0x3b   : > { %860 = shalt.err (!%p857_p1)
}
  0x3c   : > { %751 = dma.hbm_to_vmem [thread:$0]  (!%p1053_p11), %s1263_s3, 2048, %s1057_s6, [#allocation6], %s965_s15, %s965_s15, %s966_s16  }
  0x3d   : > { %s1112_s14 = sadd.s32 1, %s961_s21   ;;  %s29_s29 = sadd.s32 1, %s957_s20 }
  0x3e   : > { %s26_s17 = ssub.s32 %s961_s21, %s1112_s14  ;;  %p36_p13 = scmp.ne.s32.totalorder %s957_s20, %s953_s19 }
  0x3f   : > { %p27_p6 = scmp.eq.s32.totalorder %s26_s17, 0  ;;  %p37_p10 = scmp.eq.s32.totalorder %s961_s21, 0 }
  0x40   : > { %p1273_p3 = scmp.eq.s32.totalorder %s1023_s22, 1  ;;  %p762_p7 = scmp.lt.s32.totalorder %s961_s21, 2 }
  0x41   : > { %s1128_s27 = scalar_select %p27_p6, %s957_s20, %s29_s29  }
  0x42   : > { %p1122_p5 = por %p1273_p3, %p36_p13  ;;  %p38_p9 = por %p37_p10, %p36_p13 }
  0x43   : > { %s208_s30 = sand.u32 1, %s957_s20   ;;  %s569_s6 = sshll.u32 %s961_s21, 7 }
  0x44   : > { %s1274_s23 = scalar_select %p1122_p5, 1, 0 }
  0x45   : > { %s568_s7 = sshll.u32 %s208_s30, 3  ;;  %s1135_s8 = scalar_lea.hbm %s1260_s0, %s569_s6 }
  0x46   : > { %s212_s9 = scalar_lea.vmem [#allocation2], %s568_s7  ;;  %p1139_p11 = pnand %p762_p7, %p38_p9 }
  0x47   : > { %s219_s10 = sshll.u32 %s212_s9, 4  ;;  %s209_s28 = scalar_lea.sflag [#allocation3], %s208_s30  ;;  %s1137_s10 = int_to_ptr.vmem [resolvable:$true] %s219_s10 }
  0x48   : > { %s861_s12 = scalar_lea.hbm %s1135_s8, 128  ;;  %p863_p0 = pneg %p1139_p11 }
  0x49   : > { %p862_p12 = scmp.ne.s32.totalorder %s1135_s8, %s861_s12  ;;  %s866_s17 = scalar_lea.hbm %s1260_s0, 256 }
  0x4a   : > { %p867_p13 = scmp.lt.u32.totalorder %s1135_s8, %s1260_s0  ;;  %p868_p6 = scmp.lt.u32.totalorder %s866_s17, %s861_s12 }
  0x4b   : > { %p864_p2 = pnand %p863_p0, %p862_p12  ;;  %p870_p3 = scmp.lt.u32.totalorder %s861_s12, %s1135_s8 }
  0x4c   : > { %p869_p10 = por %p868_p6, %p867_p13 }
  0x4d   : > { %p865_p1 = pneg %p864_p2 }
  0x4e   : > { %p871_p7 = por %p870_p3, %p869_p10 }
  0x50   : > { %p872_p9 = pnand %p871_p7, %p865_p1 }
  0x52   : > { %875 = shalt.err (!%p872_p9)
}
  0x53   : > { %s876_s30 = scalar_lea.vmem %s1137_s10, 128  ;;  %s967_s15 = smov [#allocation2]  }
  0x54   : > { %p877_p12 = scmp.ne.s32.totalorder %s1137_s10, %s876_s30  ;;  %s881_s16 = sshll.u32 %s967_s15, 4  ;;  %s882_s16 = int_to_ptr.vmem [resolvable:$false] %s881_s16 }
  0x55   : > { %s883_s9 = scalar_lea.vmem %s882_s16, 256  ;;  %p884_p4 = scmp.lt.s32.totalorder %s1137_s10, %s882_s16 }
  0x56   : > { %p879_p2 = pnand %p877_p12, %p863_p0  ;;  %p885_p13 = scmp.lt.s32.totalorder %s883_s9, %s876_s30 }
  0x58   : > { %p880_p5 = pneg %p879_p2  ;;  %p886_p6 = por %p885_p13, %p884_p4 }
  0x5a   : > { %p887_p10 = pnand %p886_p6, %p880_p5 }
  0x5c   : > { %890 = shalt.err (!%p887_p10)
}
  0x5d   : > { %755 = dma.hbm_to_vmem [thread:$0]  (!%p1139_p11), %s1135_s8, 128, %s1137_s10, %s209_s28  }
  0x5e   : > { %228 = sbr.rel (%p1042_p8) target bundleno = 587 (0x24b), region = 40  ;;  %s1171_s12 = sand.u32 (!%p1042_p8), 1, %s953_s19  }
  0x5f   : > { %s571_s13 = sshll.u32 (!%p1042_p8), %s1171_s12, 3  ;;  %s231_s29 = scalar_lea.sflag (!%p1042_p8), [#allocation3], %s1171_s12 }
  0x60   : > { %s1177_s17 = scalar_lea.vmem (!%p1042_p8), [#allocation2], %s571_s13  ;;  %p1276_p4 = scmp.ne.s32.totalorder (!%p1042_p8), %s1269_s24, 0 }
  0x65   : > { %936 = dma.done.wait (%p1276_p4), %s231_s29, 128  }
  0x66   : > { %938 = vsyncadd (%p1276_p4), %s231_s29, 4294967168  ;;  %p1277_p5 = scmp.eq.s32.totalorder %s1023_s22, 0 }
  0x68   : > { %940 = dma.done.wait (%p1277_p5), [#allocation6], 4096   ;;  %p1278_p8 = pmov %p1277_p5 }
  0x69   : > { %v968_v0 = vmov 0.0|0.0   ;;  %vm969_vm0 = vmmov 0   ;;  %v970_v1 = vmov 0.0   ;;  %v270_v2 = vld [vmem:[#allocation5] sm:$0xff]  ;;  %v271_v3 = vld [vmem:[#allocation5 + $0x8] sm:$0xff]  ;;  %v272_v4 = vld [vmem:[#allocation5 + $0x10] sm:$0xff] }
  0x6a   : > { %942 = vsyncadd (%p1278_p8), [#allocation6], 4294963200  ;;  %685 = vmatprep.subr.bf16.mxu0 %v968_v0  ;;  %647 = vmatprep.mubr.msk.f32.mxu0 %vm969_vm0, %v970_v1  ;;  %v686_v5 = vpack.c.bf16 %v271_v3, %v270_v2  ;;  %v273_v6 = vld [vmem:[#allocation5 + $0x18] sm:$0xff]  ;;  %v274_v8 = vld [vmem:[#allocation5 + $0x20] sm:$0xff]  ;;  %s578_s11 = sshll.u32 %s1023_s22, 7  ;;  %s268_s28 = scalar_lea.vmem [#allocation8], %s571_s13 }
  0x6b   : > { %709 = vmatprep.subr.bf16.mxu1 %v968_v0  ;;  %682 = vmatprep.mubr.msk.f32.mxu1 %vm969_vm0, %v970_v1  ;;  %v689_v7 = vpack.c.bf16 %v273_v6, %v272_v4  ;;  %v275_v9 = vld [vmem:[#allocation5 + $0x28] sm:$0xff]  ;;  %v364_v10 = vld [vmem:[#allocation7] sm:$0xff]  ;;  %v366_v12 = vld [vmem:[#allocation7 + $0x10] sm:$0xff]  ;;  %s474_s7 = sshll.u32 %s268_s28, 4  ;;  %s1216_s15 = scalar_lea.hbm %s1265_s5, %s578_s11  ;;  %s1218_s7 = int_to_ptr.vmem [resolvable:$true] %s474_s7 }
  0x6c   : > { %687 = vmatpush3.bf16.msra.mxu0 %v686_v5  ;;  %v365_v11 = vld [vmem:[#allocation7 + $0x8] sm:$0xff]  ;;  %v367_v13 = vld [vmem:[#allocation7 + $0x18] sm:$0xff]  ;;  %v692_v14 = vpack.c.bf16 %v275_v9, %v274_v8  ;;  %v276_v16 = vld [vmem:[#allocation5 + $0x30] sm:$0xff]  ;;  %s461_s16 = scalar_lea.sflag [#allocation4], %s1171_s12  ;;  %s891_s9 = scalar_lea.vmem %s1218_s7, 128 }
  0x6d   : > { %688 = vmatprep.subr.bf16.mxu0 %v968_v0  ;;  %v710_v15 = vpack.c.bf16 %v365_v11, %v364_v10  ;;  %v277_v17 = vld [vmem:[#allocation5 + $0x38] sm:$0xff]  ;;  %v713_v18 = vpack.c.bf16 %v367_v13, %v366_v12  ;;  %v368_v19 = vld [vmem:[#allocation7 + $0x20] sm:$0xff]  ;;  %v369_v20 = vld [vmem:[#allocation7 + $0x28] sm:$0xff]  ;;  %p892_p11 = scmp.ne.s32.totalorder %s1218_s7, %s891_s9  ;;  %p1279_p0 = scmp.ne.s32.totalorder %s1274_s23, 0 }
  0x6e   : > { %v695_v21 = vpack.c.bf16 %v277_v17, %v276_v16  ;;  %v278_v22 = vld [vmem:[#allocation5 + $0x40] sm:$0xff]  ;;  %v279_v23 = vld [vmem:[#allocation5 + $0x48] sm:$0xff]  ;;  %v716_v24 = vpack.c.bf16 %v369_v20, %v368_v19  ;;  %v370_v25 = vld [vmem:[#allocation7 + $0x30] sm:$0xff]  ;;  %s971_s22 = smov [#allocation8]  }
  0x6f   : > { %711 = vmatpush3.bf16.msra.mxu1 %v710_v15  ;;  %v371_v26 = vld [vmem:[#allocation7 + $0x38] sm:$0xff]  ;;  %v698_v27 = vpack.c.bf16 %v279_v23, %v278_v22  ;;  %v280_v28 = vld [vmem:[#allocation5 + $0x50] sm:$0xff]  ;;  %v372_v31 = vld [vmem:[#allocation7 + $0x40] sm:$0xff]  ;;  %p893_p1 = pnand %p892_p11, %p1279_p0  ;;  %s895_s13 = sshll.u32 %s971_s22, 4  ;;  %s896_s13 = int_to_ptr.vmem [resolvable:$false] %s895_s13 }
  0x70   : > { %690 = vmatpush3.bf16.msra.mxu0 %v689_v7  ;;  %712 = vmatprep.subr.bf16.mxu1 %v968_v0  ;;  %v281_v29 = vld [vmem:[#allocation5 + $0x58] sm:$0xff]  ;;  %v719_v30 = vpack.c.bf16 %v371_v26, %v370_v25  ;;  %v373_v32 = vld [vmem:[#allocation7 + $0x48] sm:$0xff]  ;;  %v282_v34 = vld [vmem:[#allocation5 + $0x60] sm:$0xff]  ;;  %s897_s29 = scalar_lea.vmem %s896_s13, 256  ;;  %p898_p7 = scmp.lt.s32.totalorder %s1218_s7, %s896_s13 }
  0x71   : > { %691 = vmatprep.subr.bf16.mxu0 %v968_v0  ;;  %v701_v33 = vpack.c.bf16 %v281_v29, %v280_v28  ;;  %v283_v35 = vld [vmem:[#allocation5 + $0x68] sm:$0xff]  ;;  %v722_v36 = vpack.c.bf16 %v373_v32, %v372_v31  ;;  %v374_v37 = vld [vmem:[#allocation7 + $0x50] sm:$0xff]  ;;  %v375_v38 = vld [vmem:[#allocation7 + $0x58] sm:$0xff]  ;;  %p894_p3 = pneg %p893_p1  ;;  %p899_p9 = scmp.lt.s32.totalorder %s897_s29, %s891_s9 }
  0x72   : > { %v704_v39 = vpack.c.bf16 %v283_v35, %v282_v34  ;;  %v284_v40 = vld [vmem:[#allocation5 + $0x70] sm:$0xff]  ;;  %v285_v41 = vld [vmem:[#allocation5 + $0x78] sm:$0xff]  ;;  %v725_v42 = vpack.c.bf16 %v375_v38, %v374_v37  ;;  %v376_v43 = vld [vmem:[#allocation7 + $0x60] sm:$0xff] }
  0x73   : > { %714 = vmatpush3.bf16.msra.mxu1 %v713_v18  ;;  %v377_v44 = vld [vmem:[#allocation7 + $0x68] sm:$0xff]  ;;  %v707_v45 = vpack.c.bf16 %v285_v41, %v284_v40  ;;  %v269_v47 = vld [vmem:[%s1177_s17] sm:$0xff]  ;;  %p900_p12 = por %p899_p9, %p898_p7 }
  0x74   : > { %693 = vmatpush3.bf16.msra.mxu0 %v692_v14  ;;  %715 = vmatprep.subr.bf16.mxu1 %v968_v0  ;;  %v728_v46 = vpack.c.bf16 %v377_v44, %v376_v43  ;;  %v378_v48 = vld [vmem:[#allocation7 + $0x70] sm:$0xff]  ;;  %v379_v49 = vld [vmem:[#allocation7 + $0x78] sm:$0xff] }
  0x75   : > { %694 = vmatprep.subr.bf16.mxu0 %v968_v0  ;;  %v731_v50 = vpack.c.bf16 %v379_v49, %v378_v48  ;;  %v575_v51 = vld [vmem:[%s1262_s2] ss:$0 sm:$0xff]  ;;  %p901_p2 = pnand %p900_p12, %p894_p3 }
  0x76   : > { %v576_v56 = vld [vmem:[%s1264_s4] ss:$0 sm:$0xff] }
  0x77   : > { %717 = vmatpush3.bf16.msra.mxu1 %v716_v24 }
  0x78   : > { %696 = vmatpush3.bf16.msra.mxu0 %v695_v21  ;;  %718 = vmatprep.subr.bf16.mxu1 %v968_v0 }
  0x79   : > { %697 = vmatprep.subr.bf16.mxu0 %v968_v0 }
  0x7b   : > { %720 = vmatpush3.bf16.msra.mxu1 %v719_v30 }
  0x7c   : > { %699 = vmatpush3.bf16.msra.mxu0 %v698_v27  ;;  %721 = vmatprep.subr.bf16.mxu1 %v968_v0 }
  0x7d   : > { %700 = vmatprep.subr.bf16.mxu0 %v968_v0 }
  0x7f   : > { %723 = vmatpush3.bf16.msra.mxu1 %v722_v36 }
  0x80   : > { %702 = vmatpush3.bf16.msra.mxu0 %v701_v33  ;;  %724 = vmatprep.subr.bf16.mxu1 %v968_v0 }
  0x81   : > { %703 = vmatprep.subr.bf16.mxu0 %v968_v0 }
  0x83   : > { %726 = vmatpush3.bf16.msra.mxu1 %v725_v42 }
  0x84   : > { %705 = vmatpush3.bf16.msra.mxu0 %v704_v39  ;;  %727 = vmatprep.subr.bf16.mxu1 %v968_v0 }
  0x85   : > { %706 = vmatprep.subr.bf16.mxu0 %v968_v0 }
  0x87   : > { %729 = vmatpush3.bf16.msra.mxu1 %v728_v46 }
  0x88   : > { %708 = vmatpush3.bf16.msra.mxu0 %v707_v45  ;;  %730 = vmatprep.subr.bf16.mxu1 %v968_v0 }
  0x8b   : > { %648 = vmatmul.mubr.f32.vlgmr.msra.gmra.mrb[0].mxu0 %v269_v47  ;;  %732 = vmatpush3.bf16.msra.mxu1 %v731_v50 }
 0x15e   : > { %v359_v52 = vpop.f32.mrb[0].mxu0 }
 0x15f   : > { %v360_v53 = vadd.f32 %v575_v51, %v359_v52  ;;  %v649_v54 = vpop.f32.mrb[1].mxu0 }
 0x161   : > { %v363_v55 = vmax.f32 %v360_v53, 0.0 }
 0x163   : > { %683 = vmatmul.mubr.f32.vlgmr.msra.gmra.mrb[0].mxu1 %v363_v55 }
 0x236   : > { %v453_v57 = vpop.f32.mrb[0].mxu1 }
 0x237   : > { %v454_v58 = vadd.f32 %v576_v56, %v453_v57  ;;  %v684_v59 = vpop.f32.mrb[1].mxu1 }
 0x239   : > { %v457_v60 = vadd.f32 %v454_v58, %v269_v47 }
 0x23b   : > { %v458_v61 = vmax.f32 %v457_v60, 0.0 }
 0x23d   : > { %459 = vst [vmem:[%s268_s28] sm:$0xff] %v458_v61 }
 0x23e   : > { %904 = shalt.err (!%p901_p2)
}
 0x23f   : > { %s905_s12 = scalar_lea.hbm %s1216_s15, 128  ;;  %s909_s26 = scalar_lea.hbm %s1265_s5, 256 }
 0x240   : > { %p906_p13 = scmp.ne.s32.totalorder %s1216_s15, %s905_s12  ;;  %p910_p4 = scmp.lt.u32.totalorder %s1216_s15, %s1265_s5 }
 0x241   : > { %p911_p5 = scmp.lt.u32.totalorder %s909_s26, %s905_s12  ;;  %p913_p11 = scmp.lt.u32.totalorder %s905_s12, %s1216_s15 }
 0x242   : > { %p907_p6 = pnand %p906_p13, %p1279_p0 }
 0x243   : > { %p912_p8 = por %p911_p5, %p910_p4 }
 0x244   : > { %p908_p10 = pneg %p907_p6 }
 0x245   : > { %p914_p1 = por %p913_p11, %p912_p8 }
 0x247   : > { %p915_p3 = pnand %p914_p1, %p908_p10 }
 0x249   : > { %918 = shalt.err (!%p915_p3)
}
 0x24a   : > { %743 = dma.vmem_to_hbm [thread:$0]  (%p1279_p0), %s1218_s7, 128, %s1216_s15, %s461_s16  }
 0x24b PF: > { %s486_s11 = sand.u32 1, %s949_s18   ;;  %p1280_p7 = scmp.ne.s32.totalorder %s1270_s25, 0 }
 0x24c   : > { %p1281_p9 = scmp.ge.s32.totalorder %s961_s21, 2  ;;  %s487_s28 = scalar_lea.sflag [#allocation4], %s486_s11 }
 0x24e   : > { %p757_p12 = pnand %p1281_p9, %p1280_p7 }
 0x250   : > { %944 = dma.done.wait (!%p757_p12), %s487_s28, 128  }
 0x251   : > { %946 = vsyncadd (!%p757_p12), %s487_s28, 4294967168  ;;  %p19_p2 = scmp.ge.s32.totalorder %s1112_s14, 4   ;;  %s1282_s18 = smov %s953_s19 }
 0x252   : > { %s1283_s19 = smov %s957_s20  ;;  %s1284_s20 = smov %s1128_s27 }
 0x253   : > { %s1285_s21 = smov %s1112_s14  ;;  %21 = sbr.rel (!%p19_p2) target bundleno = 6 (0x6), region = 93 }
 0x25a   :  { %492 = vsyncpa [#allocation3], 1 }
 0x25b   :  { %494 = vsyncpa [#allocation3 + $0x1], 1 }
 0x25c   :  { %495 = vsyncpa [#allocation6], 1 }
 0x25d   :  { %496 = vsyncpa [#allocation4], 1 }
 0x25e   :  { %498 = vsyncpa [#allocation4 + $0x1], 1 }

</bundles_post_ra>
